<compile_context>
chip_gen: v7x
topology: tpu7x:2x2x1
jax: 0.10.0
libtpu: 0.0.40
codegen_flags: <defaults>
</compile_context>

<pallas_src>
import jax
import jax.numpy as jnp
from jax.experimental import pallas as pl
from jax.experimental.pallas import tpu as pltpu


def _round_up(x, m):
    return ((x + m - 1) // m) * m


def _cdiv(a, b):
    return (a + b - 1) // b


def _make_mixer_kernel(n_ops):
    def kernel(*refs):
        x_refs = refs[:n_ops]
        w_refs = refs[n_ops:2 * n_ops]
        o_ref = refs[2 * n_ops]
        # Accumulate the per-op dots in f32 on the MXU; single store of the
        # natural-width output tile.
        acc = jnp.dot(x_refs[0][...], w_refs[0][...],
                      preferred_element_type=jnp.float32)
        for xr, wr in zip(x_refs[1:], w_refs[1:]):
            acc = acc + jnp.dot(xr[...], wr[...],
                                preferred_element_type=jnp.float32)
        o_ref[...] = acc.astype(o_ref.dtype)
    return kernel


def mixer_forward(xs, ws, n_norm=1, *, tile_n=1024):
    """y = sum_i (x_i @ W_i) / sqrt(n_norm), fused into one Pallas kernel.

    xs: list of [N, C_in_i] arrays
    ws: list of [C_in_i, C_out] arrays
    Returns [N, C_out] float32.
    """
    n_ops = len(xs)
    assert len(ws) == n_ops and n_ops >= 1
    N = xs[0].shape[0]
    c_out = ws[0].shape[1]
    assert all(x.shape[0] == N for x in xs)
    assert all(w.shape[1] == c_out for w in ws)
    assert all(x.shape[1] == w.shape[0] for x, w in zip(xs, ws))

    # Fold the (static) neighbor normalization into the tiny weight matrices.
    scale = 1.0 / float(n_norm) ** 0.5
    ws_scaled = [w.astype(jnp.float32) * scale for w in ws]

    # Row tile: big enough to amortize per-step overhead, multiple of 8
    # sublanes; shrink for small N so v7x's two TensorCores both get work.
    tile = min(tile_n, _round_up(N, 8))
    if _cdiv(N, tile) < 2 and N >= 16:
        tile = _round_up(_cdiv(N, 2), 8)
    grid = (_cdiv(N, tile),)

    in_specs = (
        # x_i: march over rows; full (native) feature width each step.
        [pl.BlockSpec((tile, x.shape[1]), lambda i: (i, 0)) for x in xs]
        # W_i: tiny and resident (constant block index -> single DMA).
        + [pl.BlockSpec(w.shape, lambda i: (0, 0)) for w in ws_scaled]
    )
    out_specs = pl.BlockSpec((tile, c_out), lambda i: (i, 0))

    out = pl.pallas_call(
        _make_mixer_kernel(n_ops),
        out_shape=jax.ShapeDtypeStruct((N, c_out), jnp.float32),
        grid=grid,
        in_specs=in_specs,
        out_specs=out_specs,
        compiler_params=pltpu.CompilerParams(
            dimension_semantics=("parallel",),
            # Explicit, generous-but-safe budget for every generation:
            # working set is ~5 MiB double-buffered at tile_n=1024.
            vmem_limit_bytes=32 * 1024 * 1024,
        ),
    )(*xs, *ws_scaled)

    return out


def mixer_reference(xs, ws, n_norm=1):
    """Plain-JAX f32 reference mirroring the PyTorch Mixer.forward loop."""
    y = 0.0
    for x, w in zip(xs, ws):
        y = y + (x @ w) / jnp.sqrt(jnp.float32(n_norm))
    return y


if __name__ == "__main__":
    key = jax.random.PRNGKey(0)

    # Small shapes: 3 input representations with different feature widths,
    # mixed into a common output width.
    N = 128
    c_in_s = [16, 32, 24]
    c_out = 32
    n_norm = 4

    keys = jax.random.split(key, 2 * len(c_in_s))
    xs, ws = [], []
    for idx, c_in in enumerate(c_in_s):
        xs.append(jax.random.normal(keys[2 * idx], (N, c_in), dtype=jnp.float32))
        # Deterministic synthetic "checkpoint": Kaiming-ish scaled normals.
        ws.append(
            jax.random.normal(keys[2 * idx + 1], (c_in, c_out), dtype=jnp.float32)
            / jnp.sqrt(jnp.float32(c_in))
        )

    y = mixer_forward(xs, ws, n_norm=n_norm)
    y = jax.block_until_ready(y)

    y_ref = mixer_reference(xs, ws, n_norm=n_norm)
    assert y.shape == (N, c_out)
    # f32 streaming + f32 MXU accumulation (default matmul precision):
    # compare to the plain f32 reference at a modest tolerance.
    assert jnp.allclose(y, y_ref, atol=2e-2, rtol=2e-2), float(
        jnp.max(jnp.abs(y - y_ref))
    )

    print("KERNEL_OK")
</pallas_src>

<mosaic_0001>
module attributes {stable_mosaic.version = 11 : i64} {
  func.func @kernel(%arg0: i32, %arg1: memref<64x16xf32, #tpu.memory_space<vmem>>, %arg2: memref<64x32xf32, #tpu.memory_space<vmem>>, %arg3: memref<64x24xf32, #tpu.memory_space<vmem>>, %arg4: memref<16x32xf32, #tpu.memory_space<vmem>>, %arg5: memref<32x32xf32, #tpu.memory_space<vmem>>, %arg6: memref<24x32xf32, #tpu.memory_space<vmem>>, %arg7: memref<64x32xf32, #tpu.memory_space<vmem>>) attributes {dimension_semantics = [#tpu.dimension_semantics<parallel>], iteration_bounds = array<i64: 2>, scalar_prefetch = 0 : i64, scratch_operands = 0 : i64, tpu.core_type = #tpu.core_type<tc>, window_params = [{transform_indices = @transform_0, window_bounds = array<i64: 64, 16>}, {transform_indices = @transform_1, window_bounds = array<i64: 64, 32>}, {transform_indices = @transform_2, window_bounds = array<i64: 64, 24>}, {pipeline_mode = #tpu.pipeline_mode<synchronous>, transform_indices = @transform_3, window_bounds = array<i64: 16, 32>}, {pipeline_mode = #tpu.pipeline_mode<synchronous>, transform_indices = @transform_4, window_bounds = array<i64: 32, 32>}, {pipeline_mode = #tpu.pipeline_mode<synchronous>, transform_indices = @transform_5, window_bounds = array<i64: 24, 32>}, {transform_indices = @transform_6, window_bounds = array<i64: 64, 32>}]} {
    %c0 = arith.constant 0 : index
    %c0_0 = arith.constant 0 : index
    %0 = vector.load %arg1[%c0, %c0_0] : memref<64x16xf32, #tpu.memory_space<vmem>>, vector<64x16xf32>
    %c0_1 = arith.constant 0 : index
    %c0_2 = arith.constant 0 : index
    %1 = vector.load %arg4[%c0_1, %c0_2] : memref<16x32xf32, #tpu.memory_space<vmem>>, vector<16x32xf32>
    %cst = arith.constant dense<0.000000e+00> : vector<64x32xf32>
    %2 = tpu.matmul %0, %1, %cst {dimension_numbers = #tpu.dot_dimension_numbers<[1], [0], [0], [1], [0, 0, 1, 1], [], []>} : vector<64x16xf32>, vector<16x32xf32>, vector<64x32xf32> -> vector<64x32xf32>
    %c0_3 = arith.constant 0 : index
    %c0_4 = arith.constant 0 : index
    %3 = vector.load %arg2[%c0_3, %c0_4] : memref<64x32xf32, #tpu.memory_space<vmem>>, vector<64x32xf32>
    %c0_5 = arith.constant 0 : index
    %c0_6 = arith.constant 0 : index
    %4 = vector.load %arg5[%c0_5, %c0_6] : memref<32x32xf32, #tpu.memory_space<vmem>>, vector<32x32xf32>
    %cst_7 = arith.constant dense<0.000000e+00> : vector<64x32xf32>
    %5 = tpu.matmul %3, %4, %cst_7 {dimension_numbers = #tpu.dot_dimension_numbers<[1], [0], [0], [1], [0, 0, 1, 1], [], []>} : vector<64x32xf32>, vector<32x32xf32>, vector<64x32xf32> -> vector<64x32xf32>
    %6 = arith.addf %2, %5 : vector<64x32xf32>
    %c0_8 = arith.constant 0 : index
    %c0_9 = arith.constant 0 : index
    %7 = vector.load %arg3[%c0_8, %c0_9] : memref<64x24xf32, #tpu.memory_space<vmem>>, vector<64x24xf32>
    %c0_10 = arith.constant 0 : index
    %c0_11 = arith.constant 0 : index
    %8 = vector.load %arg6[%c0_10, %c0_11] : memref<24x32xf32, #tpu.memory_space<vmem>>, vector<24x32xf32>
    %cst_12 = arith.constant dense<0.000000e+00> : vector<64x32xf32>
    %9 = tpu.matmul %7, %8, %cst_12 {dimension_numbers = #tpu.dot_dimension_numbers<[1], [0], [0], [1], [0, 0, 1, 1], [], []>} : vector<64x24xf32>, vector<24x32xf32>, vector<64x32xf32> -> vector<64x32xf32>
    %10 = arith.addf %6, %9 : vector<64x32xf32>
    %c0_13 = arith.constant 0 : index
    %c0_14 = arith.constant 0 : index
    %11 = vector.load %arg7[%c0_13, %c0_14] : memref<64x32xf32, #tpu.memory_space<vmem>>, vector<64x32xf32>
    tpu.vector_store %arg7[%c0_13, %c0_14], %10 {strides = array<i32>} : memref<64x32xf32, #tpu.memory_space<vmem>>, vector<64x32xf32>,
    return
  }
  func.func @transform_0(%arg0: i32) -> (i32, i32) {
    %c0_i32 = arith.constant 0 : i32
    %c0_i32_0 = arith.constant 0 : i32
    return %arg0, %c0_i32 : i32, i32
  }
  func.func @transform_1(%arg0: i32) -> (i32, i32) {
    %c0_i32 = arith.constant 0 : i32
    %c0_i32_0 = arith.constant 0 : i32
    return %arg0, %c0_i32 : i32, i32
  }
  func.func @transform_2(%arg0: i32) -> (i32, i32) {
    %c0_i32 = arith.constant 0 : i32
    %c0_i32_0 = arith.constant 0 : i32
    return %arg0, %c0_i32 : i32, i32
  }
  func.func @transform_3(%arg0: i32) -> (i32, i32) {
    %c0_i32 = arith.constant 0 : i32
    %c0_i32_0 = arith.constant 0 : i32
    %c0_i32_1 = arith.constant 0 : i32
    return %c0_i32, %c0_i32_0 : i32, i32
  }
  func.func @transform_4(%arg0: i32) -> (i32, i32) {
    %c0_i32 = arith.constant 0 : i32
    %c0_i32_0 = arith.constant 0 : i32
    %c0_i32_1 = arith.constant 0 : i32
    return %c0_i32, %c0_i32_0 : i32, i32
  }
  func.func @transform_5(%arg0: i32) -> (i32, i32) {
    %c0_i32 = arith.constant 0 : i32
    %c0_i32_0 = arith.constant 0 : i32
    %c0_i32_1 = arith.constant 0 : i32
    return %c0_i32, %c0_i32_0 : i32, i32
  }
  func.func @transform_6(%arg0: i32) -> (i32, i32) {
    %c0_i32 = arith.constant 0 : i32
    %c0_i32_0 = arith.constant 0 : i32
    return %arg0, %c0_i32 : i32, i32
  }
}

</mosaic_0001>

<bundles_post_ra>
// kernel: tpu_custom_call.1
= control target key start
LH: loop header
LB: loop body
LE: loop exit
PB: predicated region body
PF: predicated region fallthrough
CT: control target
= control target key end

     0   :  { %s1029_s21 = smov 0   ;;  %s1147_s0 = inlined_call_operand.vmem [shape: f32[128,16], index: 0, kind: input, shape index: {}]   ;;  %s1148_s1 = inlined_call_operand.vmem [shape: f32[128,32], index: 1, kind: input, shape index: {}]   ;;  %s1149_s2 = inlined_call_operand.vmem [shape: f32[128,24], index: 2, kind: input, shape index: {}]   ;;  %s1150_s3 = inlined_call_operand.vmem [shape: f32[16,32], index: 3, kind: input, shape index: {}]   ;;  %s1151_s4 = inlined_call_operand.vmem [shape: f32[32,32], index: 4, kind: input, shape index: {}]   ;;  %s1152_s5 = inlined_call_operand.vmem [shape: f32[24,32], index: 5, kind: input, shape index: {}]   ;;  %s1153_s6 = inlined_call_operand.vmem [shape: f32[128,32], index: 6, kind: output, shape index: {}]  }
   0x1 LB: > { %s818_s22 = sadd.s32 4294967295, %s992_s21   ;;  %p822_p0 = scmp.ge.s32.totalorder %s992_s21, 1  ;;  %s992_s21 = sphi %s1029_s21, %s16_s21  }
   0x2   : > { %p235_p1 = scmp.lt.s32.totalorder %s992_s21, 3 }
   0x4   : > { %p236_p2 = pnand %p822_p0, %p235_p1 }
   0x5   : > { %v317_v0 = vld [vmem:[%s1151_s4] sm:$0xff] (!%p236_p2)  ;;  %v318_v1 = vld [vmem:[%s1151_s4 + $0x8] sm:$0xff] (!%p236_p2)  ;;  %s823_s29 = sshll.u32 (!%p236_p2), %s818_s22, 3  ;;  %v319_v5 = vld [vmem:[%s1151_s4 + $0x10] sm:$0xff] (!%p236_p2)  ;;  %vm451_vm0 = vcmask (!%p236_p2), 130048   ;;  %vm321_vm1 = vcmask (!%p236_p2), 261120  }
   0x6   : > { %239 = sbr.rel (%p236_p2) target bundleno = 255 (0xff), region = 44  ;;  %v307_v2 = vld [vmem:[%s1150_s3] sm:$0xff] (!%p236_p2)  ;;  %v944_v3 = vpack.c.bf16 (!%p236_p2), %v318_v1, %v317_v0  ;;  %v308_v4 = vld [vmem:[%s1150_s3 + $0x8] sm:$0xff] (!%p236_p2)  ;;  %v320_v6 = vld [vmem:[%s1151_s4 + $0x18] sm:$0xff] (!%p236_p2)  ;;  %p276_p3 = scmp.lt.s32.totalorder (!%p236_p2), %s823_s29, 15  ;;  %vm592_vm2 = vcmask (!%p236_p2), 195584  }
   0x7   : > { %v952_v7 = vpack.c.bf16 (!%p236_p2), %v308_v4, %v307_v2  ;;  %v948_v8 = vpack.c.bf16 (!%p236_p2), %v320_v6, %v319_v5  ;;  %v589_v9 = vld [vmem:[%s1152_s5] sm:$0xff] (!%p236_p2)  ;;  %v590_v10 = vld [vmem:[%s1152_s5 + $0x8] sm:$0xff] (!%p236_p2)  ;;  %v591_v19 = vld [vmem:[%s1152_s5 + $0x10] sm:$0xff] (!%p236_p2) }
   0x8   : > { %945 = vmatprep.subr.bf16.mxu1 (!%p236_p2), %v944_v3  ;;  %v956_v11 = vpack.c.bf16 (!%p236_p2), %v590_v10, %v589_v9 }
   0x9   : > { %947 = vmatpush3.bf16.msra.mxu1 (!%p236_p2), %v944_v3  ;;  %953 = vmatprep.subr.bf16.mxu0 (!%p236_p2), %v952_v7 }
   0xa   : > { %955 = vmatpush3.bf16.msra.mxu0 (!%p236_p2), %v952_v7  ;;  %949 = vmatprep.subr.bf16.mxu1 (!%p236_p2), %v948_v8 }
   0xb   : > { %957 = vmatprep.subr.bf16.mxu0 (!%p236_p2), %v956_v11 }
   0xd   : > { %s1155_s29 = smov (!%p276_p3, %s823_s29), 15  ;;  %951 = vmatpush3.bf16.msra.mxu1 %v948_v8 }
   0xe   : > { %s1061_s16 = sshll.u32 %s1155_s29, 3  ;;  %960 = vmatprep.subr.bf16.mxu1 %v952_v7 }
   0xf   : > { %s1067_s19 = scalar_lea.vmem %s1147_s0, %s1061_s16  ;;  %s1073_s23 = scalar_lea.vmem %s1148_s1, %s1061_s16 }
  0x10   : > { %v299_v12 = vld [vmem:[%s1067_s19] sm:$0xff]  ;;  %v300_v13 = vld [vmem:[%s1067_s19 + $0x8] sm:$0xff]  ;;  %v301_v16 = vld [vmem:[%s1067_s19 + $0x10] sm:$0xff]  ;;  %s1085_s26 = scalar_lea.vmem %s1149_s2, %s1061_s16  ;;  %s297_s7 = scalar_lea.vmem %s1153_s6, %s1061_s16 }
  0x11   : > { %v309_v14 = vld [vmem:[%s1073_s23] sm:$0xff]  ;;  %914 = vmatprep.mubr.msk.f32.mxu0 %vm451_vm0, %v299_v12  ;;  %v310_v15 = vld [vmem:[%s1073_s23 + $0x8] sm:$0xff]  ;;  %v311_v17 = vld [vmem:[%s1073_s23 + $0x10] sm:$0xff] }
  0x12   : > { %915 = vmatmul.mubr.msk.f32.vlgmr.msra.gmra.mrb[0].mxu0 %vm451_vm0, %v300_v13  ;;  %898 = vmatprep.mubr.msk.f32.mxu1 %vm321_vm1, %v309_v14  ;;  %v302_v18 = vld [vmem:[%s1067_s19 + $0x18] sm:$0xff]  ;;  %v581_v20 = vld [vmem:[%s1085_s26] sm:$0xff]  ;;  %v582_v23 = vld [vmem:[%s1085_s26 + $0x8] sm:$0xff] }
  0x13   : > { %917 = vmatprep.mubr.msk.f32.mxu0 %vm451_vm0, %v301_v16  ;;  %899 = vmatmul.mubr.msk.f32.vlgmr.msra.gmra.mrb[0].mxu1 %vm321_vm1, %v310_v15  ;;  %v312_v21 = vld [vmem:[%s1073_s23 + $0x18] sm:$0xff]  ;;  %v313_v22 = vld [vmem:[%s1073_s23 + $0x20] sm:$0xff]  ;;  %v583_v24 = vld [vmem:[%s1085_s26 + $0x10] sm:$0xff] }
  0x14   : > { %959 = vmatpush3.bf16.msra.mxu0 %v956_v11  ;;  %961 = vmatpush3.bf16.msra.mxu1 %v952_v7  ;;  %v314_v25 = vld [vmem:[%s1073_s23 + $0x28] sm:$0xff]  ;;  %v315_v26 = vld [vmem:[%s1073_s23 + $0x30] sm:$0xff]  ;;  %v584_v27 = vld [vmem:[%s1085_s26 + $0x18] sm:$0xff] }
  0x15   : > { %901 = vmatprep.mubr.msk.f32.mxu1 %vm321_vm1, %v311_v17  ;;  %930 = vmatprep.subr.mxu0 %v591_v19  ;;  %v585_v28 = vld [vmem:[%s1085_s26 + $0x20] sm:$0xff]  ;;  %v316_v29 = vld [vmem:[%s1073_s23 + $0x38] sm:$0xff]  ;;  %v586_v31 = vld [vmem:[%s1085_s26 + $0x28] sm:$0xff] }
  0x16   : > { %918 = vmatmul.mubr.msk.f32.gmra.mrb[2].mxu0 %vm451_vm0, %v302_v18  ;;  %v303_v30 = vld [vmem:[%s1067_s19 + $0x20] sm:$0xff]  ;;  %v587_v32 = vld [vmem:[%s1085_s26 + $0x30] sm:$0xff]  ;;  %v304_v33 = vld [vmem:[%s1067_s19 + $0x28] sm:$0xff] }
  0x17   : > { %932 = vmatprep.mubr.msk.f32.mxu0 %vm592_vm2, %v581_v20  ;;  %902 = vmatmul.mubr.msk.f32.gmra.mrb[2].mxu1 %vm321_vm1, %v312_v21  ;;  %v305_v34 = vld [vmem:[%s1067_s19 + $0x30] sm:$0xff]  ;;  %v588_v35 = vld [vmem:[%s1085_s26 + $0x38] sm:$0xff] }
  0x18   : > { %931 = vmatpush3.msra.mxu0 %v591_v19  ;;  %904 = vmatprep.mubr.msk.f32.mxu1 %vm321_vm1, %v313_v22  ;;  %v306_v36 = vld [vmem:[%s1067_s19 + $0x38] sm:$0xff] }
  0x1a   : > { %933 = vmatmul.mubr.msk.f32.vlgmr.msra.gmra.mrb[0].mxu0 %vm592_vm2, %v582_v23 }
  0x1b   : > { %935 = vmatprep.mubr.msk.f32.mxu0 %vm592_vm2, %v583_v24  ;;  %905 = vmatmul.mubr.msk.f32.gmra.mrb[4].mxu1 %vm321_vm1, %v314_v25 }
  0x1c   : > { %907 = vmatprep.mubr.msk.f32.mxu1 %vm321_vm1, %v315_v26 }
  0x1e   : > { %936 = vmatmul.mubr.msk.f32.gmra.mrb[2].mxu0 %vm592_vm2, %v584_v27 }
  0x1f   : > { %938 = vmatprep.mubr.msk.f32.mxu0 %vm592_vm2, %v585_v28  ;;  %908 = vmatmul.mubr.msk.f32.gmra.mrb[6].mxu1 %vm321_vm1, %v316_v29 }
  0x20   : > { %920 = vmatprep.mubr.msk.f32.mxu1 %vm451_vm0, %v303_v30 }
  0x22   : > { %939 = vmatmul.mubr.msk.f32.gmra.mrb[4].mxu0 %vm592_vm2, %v586_v31 }
  0x23   : > { %941 = vmatprep.mubr.msk.f32.mxu0 %vm592_vm2, %v587_v32  ;;  %921 = vmatmul.mubr.msk.f32.vlgmr.msra.gmra.mrb[4].mxu1 %vm451_vm0, %v304_v33 }
  0x24   : > { %923 = vmatprep.mubr.msk.f32.mxu1 %vm451_vm0, %v305_v34 }
  0x26   : > { %942 = vmatmul.mubr.msk.f32.gmra.mrb[6].mxu0 %vm592_vm2, %v588_v35 }
  0x27   : > { %924 = vmatmul.mubr.msk.f32.gmra.mrb[6].mxu1 %vm451_vm0, %v306_v36 }
  0xe6   : > { %v900_v37 = vpop.f32.mrb[0].mxu1 }
  0xe7   : > { %v412_v38 = vpop.f32.mrb[1].mxu1 }
  0xea   : > { %v903_v39 = vpop.f32.mrb[2].mxu1 }
  0xeb   : > { %v422_v40 = vpop.f32.mrb[3].mxu1 }
  0xed   : > { %v934_v41 = vpop.f32.mrb[0].mxu0 }
  0xee   : > { %v962_v42 = vadd.f32 %v934_v41, %v900_v37  ;;  %v683_v43 = vpop.f32.mrb[1].mxu0 }
  0xef   : > { %v963_v44 = vadd.f32 %v683_v43, %v412_v38 }
  0xf0   : > { %731 = vst.msk [vmem:[%s297_s7 + $0x8] sm:$0xff] %vm321_vm1, %v962_v42 }
  0xf1   : > { %730 = vst.msk [vmem:[%s297_s7] sm:$0xff] %vm321_vm1, %v963_v44  ;;  %v937_v45 = vpop.f32.mrb[2].mxu0 }
  0xf2   : > { %v964_v46 = vadd.f32 %v937_v45, %v903_v39  ;;  %v693_v47 = vpop.f32.mrb[3].mxu0 }
  0xf3   : > { %v965_v48 = vadd.f32 %v693_v47, %v422_v40 }
  0xf4   : > { %733 = vst.msk [vmem:[%s297_s7 + $0x18] sm:$0xff] %vm321_vm1, %v964_v46 }
  0xf5   : > { %732 = vst.msk [vmem:[%s297_s7 + $0x10] sm:$0xff] %vm321_vm1, %v965_v48  ;;  %v940_v49 = vpop.f32.mrb[4].mxu0 }
  0xf6   : > { %v703_v50 = vpop.f32.mrb[5].mxu0  ;;  %v922_v51 = vpop.f32.mrb[4].mxu1 }
  0xf7   : > { %v966_v52 = vadd.f32 %v940_v49, %v922_v51  ;;  %v562_v53 = vpop.f32.mrb[5].mxu1 }
  0xf8   : > { %v967_v54 = vadd.f32 %v703_v50, %v562_v53 }
  0xf9   : > { %v943_v55 = vpop.f32.mrb[6].mxu0  ;;  %735 = vst.msk [vmem:[%s297_s7 + $0x28] sm:$0xff] %vm321_vm1, %v966_v52 }
  0xfa   : > { %v713_v56 = vpop.f32.mrb[7].mxu0  ;;  %734 = vst.msk [vmem:[%s297_s7 + $0x20] sm:$0xff] %vm321_vm1, %v967_v54  ;;  %v925_v57 = vpop.f32.mrb[6].mxu1 }
  0xfb   : > { %v968_v58 = vadd.f32 %v943_v55, %v925_v57  ;;  %v572_v59 = vpop.f32.mrb[7].mxu1 }
  0xfc   : > { %v969_v60 = vadd.f32 %v713_v56, %v572_v59 }
  0xfd   : > { %737 = vst.msk [vmem:[%s297_s7 + $0x38] sm:$0xff] %vm321_vm1, %v968_v58 }
  0xfe   : > { %736 = vst.msk [vmem:[%s297_s7 + $0x30] sm:$0xff] %vm321_vm1, %v969_v60 }
  0xff PF: > { %s16_s21 = sadd.s32 1, %s992_s21  }
 0x100   : > { %p13_p4 = scmp.ge.s32.totalorder %s16_s21, 4  }
 0x102   :  { %15 = sbr.rel (!%p13_p4) target bundleno = 1 (0x1), region = 80 }

</bundles_post_ra>
